<compile_context>
chip_gen: v7x
topology: tpu7x:2x2x1
jax: 0.10.0
libtpu: 0.0.40
codegen_flags: <defaults>
</compile_context>

<pallas_src>
import functools
import math

import jax
import jax.numpy as jnp
from jax import lax
from jax.experimental import pallas as pl
from jax.experimental.pallas import tpu as pltpu


def _round_up(a: int, b: int) -> int:
    return (a + b - 1) // b * b


def mlp_kernel(x_ref, w1_ref, b1_ref, w2_ref, b2_ref, o_ref, *, h_chunk):
    # x_ref : (tm, Cp)  bf16      w1_ref: (Cp, Hp) bf16   b1_ref: (1, Hp) f32
    # w2_ref: (Hp, Cp)  bf16      b2_ref: (1, Cp)  f32    o_ref : (tm, Cp) f32
    x = x_ref[...]
    tm = x.shape[0]
    Cp = o_ref.shape[1]
    Hp = w1_ref.shape[1]
    inv_sqrt2 = 1.0 / math.sqrt(2.0)

    # Accumulate the c_proj output over H-chunks so the (tm, h_chunk) GELU
    # intermediate stays small (bounded live range -> no VMEM spills at big tm).
    acc = jnp.zeros((tm, Cp), jnp.float32)
    for c0 in range(0, Hp, h_chunk):
        # c_fc chunk: x @ W1[:, chunk] (MXU bf16 inputs, f32 accumulation)
        h = jnp.dot(x, w1_ref[:, c0:c0 + h_chunk],
                    preferred_element_type=jnp.float32)
        h = h + b1_ref[:, c0:c0 + h_chunk]
        # exact (erf-based) GELU in f32 -- matches torch.nn.GELU() default;
        # erf rides the EUP slot, nearly free while the MXU is busy.
        h = 0.5 * h * (1.0 + lax.erf(h * inv_sqrt2))
        # c_proj chunk: accumulate into the f32 output accumulator.
        acc = acc + jnp.dot(h.astype(jnp.bfloat16),
                            w2_ref[c0:c0 + h_chunk, :],
                            preferred_element_type=jnp.float32)

    # bias added once at finalize (not per chunk), then one lane-dense store.
    # TODO(synk): training-mode dropout (pltpu.prng_random_bits) not implemented;
    # eval mode / p=0.0 is the identity.
    o_ref[...] = (acc + b2_ref[...]).astype(o_ref.dtype)


def mlp_pallas(x, w1, b1, w2, b2, *, tm=256, h_chunk=512):
    """x: [B, T, C] float32, w1: [C, 4C], b1: [4C], w2: [4C, C], b2: [C]."""
    B, T, C = x.shape
    H = w1.shape[1]
    M = B * T

    # Pad feature dims to lane width (128); row tile is a multiple of 16 (bf16
    # sublane packing) and rows are padded to a whole number of tiles.
    Cp = _round_up(C, 128)
    Hp = _round_up(H, 128)
    tm_eff = _round_up(min(tm, _round_up(M, 16)), 16)
    Mp = _round_up(M, tm_eff)
    hc = math.gcd(Hp, _round_up(min(h_chunk, Hp), 128))  # divides Hp, >=128

    x2 = x.reshape(M, C)
    xp = jnp.pad(x2, ((0, Mp - M), (0, Cp - C))).astype(jnp.bfloat16)
    w1p = jnp.pad(w1, ((0, Cp - C), (0, Hp - H))).astype(jnp.bfloat16)
    b1p = jnp.pad(b1, (0, Hp - H)).reshape(1, Hp).astype(jnp.float32)
    w2p = jnp.pad(w2, ((0, Hp - H), (0, Cp - C))).astype(jnp.bfloat16)
    b2p = jnp.pad(b2, (0, Cp - C)).reshape(1, Cp).astype(jnp.float32)

    # Advisory cost hint so XLA can overlap neighbouring ops with this kernel.
    cost = pl.CostEstimate(
        flops=4 * Mp * Cp * Hp,                  # two matmuls
        transcendentals=Mp * Hp,                 # erf
        bytes_accessed=(xp.size * 2 + w1p.size * 2 + w2p.size * 2
                        + b1p.size * 4 + b2p.size * 4 + Mp * Cp * 4),
    )

    # Resident weights + biases are double-buffered by default; raise the
    # scoped-VMEM limit only when the 16/32 MiB defaults would bind (large C).
    est_vmem = 2 * ((w1p.size + w2p.size) * 2 + (b1p.size + b2p.size) * 4
                    + tm_eff * Cp * (2 + 4) + tm_eff * hc * 4)
    cp_kwargs = dict(dimension_semantics=("parallel",))
    if est_vmem > 16 * 1024 * 1024:
        cp_kwargs["vmem_limit_bytes"] = min(2 * est_vmem, 64 * 1024 * 1024)

    out = pl.pallas_call(
        functools.partial(mlp_kernel, h_chunk=hc),
        out_shape=jax.ShapeDtypeStruct((Mp, Cp), jnp.float32),
        grid_spec=pltpu.PrefetchScalarGridSpec(
            num_scalar_prefetch=0,
            grid=(Mp // tm_eff,),
            in_specs=[
                pl.BlockSpec((tm_eff, Cp), lambda i: (i, 0)),  # x row tile
                pl.BlockSpec((Cp, Hp), lambda i: (0, 0)),      # W1 (resident)
                pl.BlockSpec((1, Hp), lambda i: (0, 0)),       # b1
                pl.BlockSpec((Hp, Cp), lambda i: (0, 0)),      # W2 (resident)
                pl.BlockSpec((1, Cp), lambda i: (0, 0)),       # b2
            ],
            out_specs=pl.BlockSpec((tm_eff, Cp), lambda i: (i, 0)),
        ),
        compiler_params=pltpu.CompilerParams(**cp_kwargs),
        cost_estimate=cost,
    )(xp, w1p, b1p, w2p, b2p)

    return out[:M, :C].reshape(B, T, C)


def reference_mlp(x, w1, b1, w2, b2):
    h = x @ w1 + b1
    h = 0.5 * h * (1.0 + lax.erf(h / jnp.sqrt(2.0)))
    return h @ w2 + b2


if __name__ == "__main__":
    # config: n_embd=32, bias=True, dropout=0.0 (eval mode)
    B, T, C = 2, 8, 32
    H = 4 * C

    key = jax.random.PRNGKey(0)
    kx, k1, k2, k3, k4 = jax.random.split(key, 5)

    x = jax.random.normal(kx, (B, T, C), dtype=jnp.float32)
    # deterministic parameter init (uniform like PyTorch Linear, fixed seed)
    bound1 = 1.0 / math.sqrt(C)
    bound2 = 1.0 / math.sqrt(H)
    w1 = jax.random.uniform(k1, (C, H), jnp.float32, -bound1, bound1)
    b1 = jax.random.uniform(k2, (H,), jnp.float32, -bound1, bound1)
    w2 = jax.random.uniform(k3, (H, C), jnp.float32, -bound2, bound2)
    b2 = jax.random.uniform(k4, (C,), jnp.float32, -bound2, bound2)

    out = mlp_pallas(x, w1, b1, w2, b2)
    out = jax.block_until_ready(out)

    ref = reference_mlp(x, w1, b1, w2, b2)
    assert out.shape == (B, T, C)
    # bf16 MXU inputs with f32 accumulation -> relaxed tolerance vs f32 reference
    assert jnp.allclose(out, ref, atol=3e-2, rtol=3e-2), "mismatch vs reference"
    print("KERNEL_OK")
</pallas_src>

<mosaic_0001>
module attributes {stable_mosaic.version = 11 : i64} {
  func.func @mlp_kernel(%arg0: i32, %arg1: memref<16x128xbf16, #tpu.memory_space<vmem>>, %arg2: memref<128x128xbf16, #tpu.memory_space<vmem>>, %arg3: memref<1x128xf32, #tpu.memory_space<vmem>>, %arg4: memref<128x128xbf16, #tpu.memory_space<vmem>>, %arg5: memref<1x128xf32, #tpu.memory_space<vmem>>, %arg6: memref<16x128xf32, #tpu.memory_space<vmem>>) attributes {dimension_semantics = [#tpu.dimension_semantics<parallel>], iteration_bounds = array<i64: 1>, scalar_prefetch = 0 : i64, scratch_operands = 0 : i64, tpu.core_type = #tpu.core_type<tc>, window_params = [{transform_indices = @transform_0, window_bounds = array<i64: 16, 128>}, {pipeline_mode = #tpu.pipeline_mode<synchronous>, transform_indices = @transform_1, window_bounds = array<i64: 128, 128>}, {pipeline_mode = #tpu.pipeline_mode<synchronous>, transform_indices = @transform_2, window_bounds = array<i64: 1, 128>}, {pipeline_mode = #tpu.pipeline_mode<synchronous>, transform_indices = @transform_3, window_bounds = array<i64: 128, 128>}, {pipeline_mode = #tpu.pipeline_mode<synchronous>, transform_indices = @transform_4, window_bounds = array<i64: 1, 128>}, {transform_indices = @transform_5, window_bounds = array<i64: 16, 128>}]} {
    %c0 = arith.constant 0 : index
    %c0_0 = arith.constant 0 : index
    %0 = vector.load %arg1[%c0, %c0_0] : memref<16x128xbf16, #tpu.memory_space<vmem>>, vector<16x128xbf16>
    %cst = arith.constant 0.000000e+00 : f32
    %1 = vector.broadcast %cst : f32 to vector<16x128xf32>
    %c0_1 = arith.constant 0 : index
    %c0_2 = arith.constant 0 : index
    %2 = vector.load %arg2[%c0_1, %c0_2] : memref<128x128xbf16, #tpu.memory_space<vmem>>, vector<128x128xbf16>
    %cst_3 = arith.constant dense<0.000000e+00> : vector<16x128xf32>
    %3 = tpu.matmul %0, %2, %cst_3 {dimension_numbers = #tpu.dot_dimension_numbers<[1], [0], [0], [1], [0, 0, 1, 1], [], []>} : vector<16x128xbf16>, vector<128x128xbf16>, vector<16x128xf32> -> vector<16x128xf32>
    %c0_4 = arith.constant 0 : index
    %c0_5 = arith.constant 0 : index
    %4 = vector.load %arg3[%c0_4, %c0_5] : memref<1x128xf32, #tpu.memory_space<vmem>>, vector<1x128xf32>
    %5 = vector.broadcast %4 : vector<1x128xf32> to vector<16x128xf32>
    %6 = arith.addf %3, %5 : vector<16x128xf32>
    %cst_6 = arith.constant 5.000000e-01 : f32
    %7 = vector.broadcast %cst_6 : f32 to vector<16x128xf32>
    %8 = arith.mulf %7, %6 : vector<16x128xf32>
    %cst_7 = arith.constant 0.707106769 : f32
    %9 = vector.broadcast %cst_7 : f32 to vector<16x128xf32>
    %10 = arith.mulf %6, %9 : vector<16x128xf32>
    %11 = math.erf %10 : vector<16x128xf32>
    %cst_8 = arith.constant 1.000000e+00 : f32
    %12 = vector.broadcast %cst_8 : f32 to vector<16x128xf32>
    %13 = arith.addf %12, %11 : vector<16x128xf32>
    %14 = arith.mulf %8, %13 : vector<16x128xf32>
    %15 = arith.truncf %14 : vector<16x128xf32> to vector<16x128xbf16>
    %c0_9 = arith.constant 0 : index
    %c0_10 = arith.constant 0 : index
    %16 = vector.load %arg4[%c0_9, %c0_10] : memref<128x128xbf16, #tpu.memory_space<vmem>>, vector<128x128xbf16>
    %cst_11 = arith.constant dense<0.000000e+00> : vector<16x128xf32>
    %17 = tpu.matmul %15, %16, %cst_11 {dimension_numbers = #tpu.dot_dimension_numbers<[1], [0], [0], [1], [0, 0, 1, 1], [], []>} : vector<16x128xbf16>, vector<128x128xbf16>, vector<16x128xf32> -> vector<16x128xf32>
    %18 = arith.addf %1, %17 : vector<16x128xf32>
    %c0_12 = arith.constant 0 : index
    %c0_13 = arith.constant 0 : index
    %19 = vector.load %arg5[%c0_12, %c0_13] : memref<1x128xf32, #tpu.memory_space<vmem>>, vector<1x128xf32>
    %20 = vector.broadcast %19 : vector<1x128xf32> to vector<16x128xf32>
    %21 = arith.addf %18, %20 : vector<16x128xf32>
    %c0_14 = arith.constant 0 : index
    %c0_15 = arith.constant 0 : index
    %22 = vector.load %arg6[%c0_14, %c0_15] : memref<16x128xf32, #tpu.memory_space<vmem>>, vector<16x128xf32>
    tpu.vector_store %arg6[%c0_14, %c0_15], %21 {strides = array<i32>} : memref<16x128xf32, #tpu.memory_space<vmem>>, vector<16x128xf32>,
    return
  }
  func.func @transform_0(%arg0: i32) -> (i32, i32) {
    %c0_i32 = arith.constant 0 : i32
    %c0_i32_0 = arith.constant 0 : i32
    return %arg0, %c0_i32 : i32, i32
  }
  func.func @transform_1(%arg0: i32) -> (i32, i32) {
    %c0_i32 = arith.constant 0 : i32
    %c0_i32_0 = arith.constant 0 : i32
    %c0_i32_1 = arith.constant 0 : i32
    return %c0_i32, %c0_i32_0 : i32, i32
  }
  func.func @transform_2(%arg0: i32) -> (i32, i32) {
    %c0_i32 = arith.constant 0 : i32
    %c0_i32_0 = arith.constant 0 : i32
    %c0_i32_1 = arith.constant 0 : i32
    return %c0_i32, %c0_i32_0 : i32, i32
  }
  func.func @transform_3(%arg0: i32) -> (i32, i32) {
    %c0_i32 = arith.constant 0 : i32
    %c0_i32_0 = arith.constant 0 : i32
    %c0_i32_1 = arith.constant 0 : i32
    return %c0_i32, %c0_i32_0 : i32, i32
  }
  func.func @transform_4(%arg0: i32) -> (i32, i32) {
    %c0_i32 = arith.constant 0 : i32
    %c0_i32_0 = arith.constant 0 : i32
    %c0_i32_1 = arith.constant 0 : i32
    return %c0_i32, %c0_i32_0 : i32, i32
  }
  func.func @transform_5(%arg0: i32) -> (i32, i32) {
    %c0_i32 = arith.constant 0 : i32
    %c0_i32_0 = arith.constant 0 : i32
    return %arg0, %c0_i32 : i32, i32
  }
}

</mosaic_0001>

<bundles_post_ra>
// kernel: tpu_custom_call.1
= control target key start
LH: loop header
LB: loop body
LE: loop exit
PB: predicated region body
PF: predicated region fallthrough
CT: control target
= control target key end

     0   :  { %10 = vsyncpa [#allocation3], 0  ;;  %s638_s0 = inlined_call_operand.hbm [shape: bf16[16,128], index: 0, kind: input, shape index: {}]   ;;  %s639_s1 = inlined_call_operand.hbm [shape: bf16[128,128], index: 1, kind: input, shape index: {}]   ;;  %s640_s2 = inlined_call_operand.vmem [shape: f32[1,128], index: 2, kind: input, shape index: {}]   ;;  %s641_s3 = inlined_call_operand.hbm [shape: bf16[128,128], index: 3, kind: input, shape index: {}]   ;;  %s642_s4 = inlined_call_operand.vmem [shape: f32[1,128], index: 4, kind: input, shape index: {}]   ;;  %s643_s5 = inlined_call_operand.hbm [shape: f32[16,128], index: 5, kind: output, shape index: {}]  }
   0x1   :  { %11 = vsyncpa [#allocation6], 0 }
   0x2   :  { %12 = vsyncpa [#allocation4], 0  ;;  %s528_s18 = smov [#allocation5]   ;;  %s529_s20 = smov [#allocation2]  }
   0x3   :  { %s30_s19 = sshll.u32 %s528_s18, 4  ;;  %s18_s21 = sshll.u32 %s529_s20, 4  ;;  %s31_s19 = int_to_ptr.vmem [resolvable:$true] %s30_s19  ;;  %s568_s21 = int_to_ptr.vmem [resolvable:$true] %s18_s21 }
   0x4   :  { %s434_s24 = scalar_lea.hbm %s639_s1, 1024 }
   0x5   :  { %p435_p0 = scmp.ne.s32.totalorder %s639_s1, %s434_s24  ;;  %p438_p1 = scmp.lt.u32.totalorder %s434_s24, %s639_s1 }
   0x7   :  { %p440_p2 = pnand %p438_p1, %p435_p0 }
   0x9   :  { %443 = shalt.err (!%p440_p2)
}
   0xa   :  { %s444_s29 = scalar_lea.vmem %s31_s19, 1024  ;;  %p449_p4 = scmp.lt.s32.totalorder %s31_s19, %s31_s19 }
   0xb   :  { %p445_p3 = scmp.ne.s32.totalorder %s31_s19, %s444_s29  ;;  %p450_p5 = scmp.lt.s32.totalorder %s444_s29, %s444_s29 }
   0xd   :  { %p451_p6 = por %p450_p5, %p449_p4 }
   0xf   :  { %p452_p7 = pnand %p451_p6, %p445_p3 }
  0x11   :  { %455 = shalt.err (!%p452_p7)
}
  0x12   :  { %s530_s30 = smov 64   ;;  %s531_s6 = smov 4  }
  0x13   :  { %36 = dma.hbm_to_vmem [thread:$0]  %s639_s1, 1024, %s31_s19, [#allocation6], %s530_s30, %s530_s30, %s531_s6  }
  0x14   :  { %s456_s11 = scalar_lea.hbm %s638_s0, 128 }
  0x15   :  { %p457_p8 = scmp.ne.s32.totalorder %s638_s0, %s456_s11  ;;  %p460_p9 = scmp.lt.u32.totalorder %s456_s11, %s638_s0 }
  0x17   :  { %p462_p10 = pnand %p460_p9, %p457_p8 }
  0x19   :  { %465 = shalt.err (!%p462_p10)
}
  0x1a   :  { %s466_s16 = scalar_lea.vmem %s568_s21, 128  ;;  %p471_p12 = scmp.lt.s32.totalorder %s568_s21, %s568_s21 }
  0x1b   :  { %p467_p11 = scmp.ne.s32.totalorder %s568_s21, %s466_s16  ;;  %p472_p13 = scmp.lt.s32.totalorder %s466_s16, %s466_s16 }
  0x1d   :  { %p473_p0 = por %p472_p13, %p471_p12 }
  0x1f   :  { %p474_p1 = pnand %p473_p0, %p467_p11 }
  0x21   :  { %477 = shalt.err (!%p474_p1)
}
  0x22   :  { %24 = dma.hbm_to_vmem [thread:$0]  %s638_s0, 128, %s568_s21, [#allocation3], %s530_s30, %s530_s30, %s531_s6  }
  0x23   :  { %s532_s18 = smov [#allocation7]   ;;  %s478_s23 = scalar_lea.hbm %s641_s3, 1024 }
  0x24   :  { %s44_s19 = sshll.u32 %s532_s18, 4  ;;  %p479_p2 = scmp.ne.s32.totalorder %s641_s3, %s478_s23  ;;  %s45_s19 = int_to_ptr.vmem [resolvable:$true] %s44_s19 }
  0x25   :  { %p482_p3 = scmp.lt.u32.totalorder %s478_s23, %s641_s3 }
  0x27   :  { %p484_p4 = pnand %p482_p3, %p479_p2 }
  0x29   :  { %487 = shalt.err (!%p484_p4)
}
  0x2a   :  { %s488_s28 = scalar_lea.vmem %s45_s19, 1024  ;;  %p493_p6 = scmp.lt.s32.totalorder %s45_s19, %s45_s19 }
  0x2b   :  { %p489_p5 = scmp.ne.s32.totalorder %s45_s19, %s488_s28  ;;  %p494_p7 = scmp.lt.s32.totalorder %s488_s28, %s488_s28 }
  0x2d   :  { %p495_p8 = por %p494_p7, %p493_p6 }
  0x2f   :  { %p496_p9 = pnand %p495_p8, %p489_p5 }
  0x31   :  { %499 = shalt.err (!%p496_p9)
}
  0x32   :  { %50 = dma.hbm_to_vmem [thread:$0]  %s641_s3, 1024, %s45_s19, [#allocation6], %s530_s30, %s530_s30, %s531_s6  }
  0x33   :  { %522 = dma.done.wait [#allocation3], 128  }
  0x34   :  { %523 = vsyncadd [#allocation3], 4294967168 }
  0x35   :  { %524 = dma.done.wait [#allocation6], 2048  }
  0x36   :  { %525 = vsyncadd [#allocation6], 4294965248  ;;  %v533_v0 = vmov 0.0   ;;  %vm534_vm0 = vmmov 0   ;;  %v413_v1 = vld [vmem:[#allocation5] sm:$0xff]   ;;  %v414_v2 = vld [vmem:[#allocation5 + $0x8] sm:$0xff]  }
  0x37   :  { %363 = vmatprep.subr.bf16.mxu0 %v533_v0  ;;  %379 = vmatprep.mubr.msk.bf16.mxu0 %vm534_vm0, %v533_v0  ;;  %v415_v3 = vld [vmem:[#allocation5 + $0x10] sm:$0xff]   ;;  %v422_v4 = vld [vmem:[#allocation7] sm:$0xff]   ;;  %v416_v5 = vld [vmem:[#allocation5 + $0x18] sm:$0xff]   ;;  %s535_s6 = smov [#allocation8]  }
  0x38   :  { %383 = vmatprep.subr.bf16.mxu1 %v533_v0  ;;  %399 = vmatprep.mubr.msk.bf16.mxu1 %vm534_vm0, %v533_v0  ;;  %v423_v6 = vld [vmem:[#allocation7 + $0x8] sm:$0xff]   ;;  %v417_v7 = vld [vmem:[#allocation5 + $0x20] sm:$0xff]   ;;  %v419_v9 = vld [vmem:[#allocation5 + $0x30] sm:$0xff]   ;;  %s313_s7 = sshll.u32 %s535_s6, 4  ;;  %s314_s7 = int_to_ptr.vmem [resolvable:$true] %s313_s7 }
  0x39   :  { %364 = vmatpush3.bf16.msra.mxu0 %v413_v1  ;;  %384 = vmatpush3.bf16.msra.mxu1 %v422_v4  ;;  %v418_v8 = vld [vmem:[#allocation5 + $0x28] sm:$0xff]   ;;  %v420_v10 = vld [vmem:[#allocation5 + $0x38] sm:$0xff]   ;;  %v424_v12 = vld [vmem:[#allocation7 + $0x10] sm:$0xff]   ;;  %s500_s8 = scalar_lea.vmem %s314_s7, 256  ;;  %p505_p11 = scmp.lt.s32.totalorder %s314_s7, %s314_s7 }
  0x3a   :  { %365 = vmatprep.subr.bf16.mxu0 %v533_v0  ;;  %385 = vmatprep.subr.bf16.mxu1 %v533_v0  ;;  %v421_v11 = vld [vmem:[#allocation2] sm:$0xff]   ;;  %v426_v14 = vld [vmem:[#allocation7 + $0x20] sm:$0xff]   ;;  %v427_v15 = vld [vmem:[#allocation7 + $0x28] sm:$0xff]   ;;  %p501_p10 = scmp.ne.s32.totalorder %s314_s7, %s500_s8  ;;  %p506_p12 = scmp.lt.s32.totalorder %s500_s8, %s500_s8 }
  0x3b   :  { %v425_v13 = vld [vmem:[#allocation7 + $0x18] sm:$0xff]   ;;  %v428_v16 = vld [vmem:[#allocation7 + $0x30] sm:$0xff]  }
  0x3c   :  { %v429_v17 = vld [vmem:[#allocation7 + $0x38] sm:$0xff]   ;;  %p507_p13 = por %p506_p12, %p505_p11 }
  0x3d   :  { %366 = vmatpush3.bf16.msra.mxu0 %v414_v2  ;;  %386 = vmatpush3.bf16.msra.mxu1 %v423_v6  ;;  %v326_v18 = vld [vmem:[%s640_s2] ss:$0 sm:$0xff] }
  0x3e   :  { %367 = vmatprep.subr.bf16.mxu0 %v533_v0  ;;  %387 = vmatprep.subr.bf16.mxu1 %v533_v0  ;;  %v336_v36 = vld [vmem:[%s642_s4] ss:$0 sm:$0xff]  ;;  %p508_p0 = pnand %p507_p13, %p501_p10 }
  0x41   :  { %368 = vmatpush3.bf16.msra.mxu0 %v415_v3  ;;  %388 = vmatpush3.bf16.msra.mxu1 %v424_v12 }
  0x42   :  { %369 = vmatprep.subr.bf16.mxu0 %v533_v0  ;;  %389 = vmatprep.subr.bf16.mxu1 %v533_v0 }
  0x45   :  { %370 = vmatpush3.bf16.msra.mxu0 %v416_v5  ;;  %390 = vmatpush3.bf16.msra.mxu1 %v425_v13 }
  0x46   :  { %371 = vmatprep.subr.bf16.mxu0 %v533_v0  ;;  %391 = vmatprep.subr.bf16.mxu1 %v533_v0 }
  0x49   :  { %372 = vmatpush3.bf16.msra.mxu0 %v417_v7  ;;  %392 = vmatpush3.bf16.msra.mxu1 %v426_v14 }
  0x4a   :  { %373 = vmatprep.subr.bf16.mxu0 %v533_v0  ;;  %393 = vmatprep.subr.bf16.mxu1 %v533_v0 }
  0x4d   :  { %374 = vmatpush3.bf16.msra.mxu0 %v418_v8  ;;  %394 = vmatpush3.bf16.msra.mxu1 %v427_v15 }
  0x4e   :  { %375 = vmatprep.subr.bf16.mxu0 %v533_v0  ;;  %395 = vmatprep.subr.bf16.mxu1 %v533_v0 }
  0x51   :  { %376 = vmatpush3.bf16.msra.mxu0 %v419_v9  ;;  %396 = vmatpush3.bf16.msra.mxu1 %v428_v16 }
  0x52   :  { %377 = vmatprep.subr.bf16.mxu0 %v533_v0  ;;  %397 = vmatprep.subr.bf16.mxu1 %v533_v0 }
  0x55   :  { %378 = vmatpush3.bf16.msra.mxu0 %v420_v10  ;;  %398 = vmatpush3.bf16.msra.mxu1 %v429_v17 }
  0x58   :  { %380 = vmatmul.mubr.bf16.vlgmr.msra.gmra.mrb[0].mxu0 %v421_v11 }
 0x12b   :  { %v176_v19 = vpop.f32.mrb[0].mxu0 }
 0x12c   :  { %v177_v20 = vadd.f32 %v326_v18, %v176_v19  ;;  %v381_v21 = vpop.f32.mrb[1].mxu0 }
 0x12d   :  { %v179_v22 = vpop.f32.mrb[2].mxu0 }
 0x12e   :  { %v185_v23 = vmul.f32 0.70710677, %v177_v20  ;;  %v180_v24 = vadd.f32 %v326_v18, %v179_v22  ;;  %v382_v25 = vpop.f32.mrb[3].mxu0  ;;  %v183_v30 = vmul.f32 0.5, %v177_v20 }
 0x130   :  { %430 = verf.f32 %v185_v23  ;;  %v186_v26 = vmul.f32 0.70710677, %v180_v24  ;;  %v184_v31 = vmul.f32 0.5, %v180_v24 }
 0x132   :  { %432 = verf.f32 %v186_v26 }
 0x13a   :  { %v431_v27 = vpop.eup %430 }
 0x13b   :  { %v189_v28 = vadd.f32 1.0, %v431_v27 }
 0x13c   :  { %v433_v29 = vpop.eup %432 }
 0x13d   :  { %v190_v32 = vadd.f32 1.0, %v433_v29  ;;  %v191_v33 = vmul.f32 %v189_v28, %v183_v30 }
 0x13f   :  { %v192_v34 = vmul.f32 %v190_v32, %v184_v31 }
 0x141   :  { %v193_v35 = vpack.c.bf16 %v192_v34, %v191_v33 }
 0x143   :  { %400 = vmatmul.mubr.bf16.vlgmr.msra.gmra.mrb[0].mxu1 %v193_v35 }
 0x216   :  { %v299_v37 = vpop.f32.mrb[0].mxu1 }
 0x217   :  { %v300_v38 = vadd.f32 %v336_v36, %v299_v37  ;;  %v401_v39 = vpop.f32.mrb[1].mxu1 }
 0x218   :  { %v302_v40 = vpop.f32.mrb[2].mxu1 }
 0x219   :  { %306 = vst [vmem:[#allocation8] sm:$0xff] %v300_v38  ;;  %v303_v41 = vadd.f32 %v336_v36, %v302_v40  ;;  %v402_v42 = vpop.f32.mrb[3].mxu1 }
 0x21b   :  { %307 = vst [vmem:[#allocation8 + $0x8] sm:$0xff] %v303_v41 }
 0x21c   :  { %511 = shalt.err (!%p508_p0)
}
 0x21d   :  { %s512_s10 = scalar_lea.hbm %s643_s5, 256 }
 0x21e   :  { %p513_p1 = scmp.ne.s32.totalorder %s643_s5, %s512_s10  ;;  %p516_p2 = scmp.lt.u32.totalorder %s512_s10, %s643_s5 }
 0x220   :  { %p518_p3 = pnand %p516_p2, %p513_p1 }
 0x222   :  { %521 = shalt.err (!%p518_p3)
}
 0x223   :  { %s536_s15 = smov 128   ;;  %s537_s16 = smov 8  }
 0x224   :  { %319 = dma.vmem_to_hbm [thread:$0]  %s314_s7, 256, %s643_s5, [#allocation4], %s536_s15, %s536_s15, %s537_s16  }
 0x225   :  { %526 = dma.done.wait [#allocation4], 256  }
 0x226   :  { %527 = vsyncadd [#allocation4], 4294967040 }
 0x227   :  { %323 = vsyncpa [#allocation3], 1 }
 0x228   :  { %324 = vsyncpa [#allocation6], 1 }
 0x229   :  { %325 = vsyncpa [#allocation4], 1 }

</bundles_post_ra>
